<compile_context>
chip_gen: v6e
topology: v6e:2x2x1
jax: 0.10.0
libtpu: 0.0.40
codegen_flags: <defaults>
</compile_context>

<pallas_src>
import jax
import jax.numpy as jnp
from jax import lax
from jax.experimental import pallas as pl
from jax.experimental.pallas import tpu as pltpu


def _dense_bias_kernel(x_ref, wt_ref, b_ref, o_ref):
    # x_ref: (tm, H_in)   wt_ref: (H_in, H_out) (pre-transposed; contraction on RHS axis 0)
    # b_ref: (1, H_out)   o_ref: (tm, H_out)
    acc = lax.dot_general(
        x_ref[...], wt_ref[...],
        dimension_numbers=(((1,), (0,)), ((), ())),   # x @ W_t on the MXU, no vxpose needed
        preferred_element_type=jnp.float32)
    acc = acc + b_ref[...].astype(jnp.float32)
    # Dropout: inference-mode identity (hidden_dropout_prob only active in training).
    # TODO(synk): training-mode dropout (pltpu.prng_random_bits mask) not emitted here.
    o_ref[...] = acc.astype(o_ref.dtype)


def _round_up(x, m):
    return ((x + m - 1) // m) * m


def _vmem_bytes(tm, h_in, h_out, x_bytes, w_bytes, o_bytes):
    # Double-buffered activation/output tiles + f32 accumulator staging + resident weight/bias.
    # Weight counted x2 so the estimate also covers the double-buffered fallback path.
    return (2 * tm * h_in * x_bytes          # activation row tile (pipelined)
            + 2 * tm * h_out * o_bytes       # output tile (pipelined)
            + tm * h_out * 4                 # f32 dot result staged before bias-add/cast/store
            + 2 * h_in * h_out * w_bytes     # weight (resident)
            + 2 * h_out * 4)                 # bias (resident)


def _vmem_budget_bytes():
    # ~96 MiB on 128-MiB chips (v5e/v6e); ~40 MiB on 64-MiB chips (v7x) so that
    # 1.25x headroom (~50 MiB) still leaves room for Mosaic internal scratch.
    try:
        cap = pltpu.get_tpu_info().vmem_capacity_bytes
    except Exception:
        cap = None
    if cap is not None and cap >= 96 * 1024 * 1024:
        return 96 * 1024 * 1024
    return 40 * 1024 * 1024


def _num_tensorcores():
    # v7x packs 2 TensorCores per chip; v5e/v6e expose 1 per device.
    try:
        kind = (jax.devices()[0].device_kind or "").lower()
    except Exception:
        return 1
    return 2 if "7" in kind else 1


def prepare_self_output_params(weight, bias, dtype=None):
    """One-time (model-init) parameter prep.

    weight: [H_out, H_in] (PyTorch nn.Linear layout) -> returns weight_t [H_in, H_out].
    bias is kept/returned in f32 (the kernel adds it in f32 regardless of activation dtype).
    Pass dtype=jnp.bfloat16 to cast the weight once for full MXU throughput.
    """
    weight_t = jnp.asarray(weight).T
    if dtype is not None:
        weight_t = weight_t.astype(dtype)
    return weight_t, jnp.asarray(bias).astype(jnp.float32)


def quant_vit_self_output(hidden_states, input_tensor, weight_t, bias, *, tm=None):
    """hidden_states: [B, S, H_in]; weight_t: [H_in, H_out] (pre-transposed, see
    prepare_self_output_params); bias: [H_out].  Returns dense(hidden_states); dropout is
    identity (eval mode); input_tensor is unused (residual connection is applied in ViTLayer)."""
    del input_tensor  # unused by this module's forward

    B, S, H_in = hidden_states.shape
    H_in_w, H_out = weight_t.shape
    assert H_in_w == H_in, "weight_t must be [H_in, H_out] (use prepare_self_output_params)"

    out_dtype = hidden_states.dtype
    M = B * S
    x2d = hidden_states.reshape(M, H_in)
    # Keep activations and weight on the same MXU input dtype (avoid silent promotion off the
    # fast path).  Prefer matching them once at model init instead of relying on this cast.
    if weight_t.dtype != x2d.dtype:
        weight_t = weight_t.astype(x2d.dtype)
    b2d = bias.reshape(1, H_out).astype(jnp.float32)

    x_bytes = x2d.dtype.itemsize
    w_bytes = weight_t.dtype.itemsize
    o_bytes = jnp.dtype(out_dtype).itemsize

    budget = _vmem_budget_bytes()
    num_tc = _num_tensorcores()

    # --- choose the row tile ---------------------------------------------------
    # Sublane granularity: 8 for 4-byte, 16 for 2-byte, 32 for 1-byte elements.
    row_align = max(8, 32 // x_bytes)
    if tm is None:
        tm = 2048 if x_bytes <= 2 else 1024
    tm_eff = max(row_align, _round_up(tm, row_align))
    # Shrink until the working set fits the VMEM budget.
    while (tm_eff > row_align
           and _vmem_bytes(tm_eff, H_in, H_out, x_bytes, w_bytes, o_bytes) > budget):
        tm_eff = max(row_align, _round_up(tm_eff // 2, row_align))
    # Clamp to M: a block equal to the full (sub-sublane-aligned) dim satisfies the layout rule.
    if tm_eff >= M:
        tm_eff = M
    # Megacore: only on 2-TC chips, and aim for >= 4 grid steps so each core still pipelines.
    if num_tc >= 2 and M >= 4 * row_align and pl.cdiv(M, tm_eff) < 4:
        tm_eff = min(tm_eff, max(row_align, _round_up(pl.cdiv(M, 4), row_align)))

    grid = (pl.cdiv(M, tm_eff),)

    need = _vmem_bytes(tm_eff, H_in, H_out, x_bytes, w_bytes, o_bytes)
    vmem_limit = int(min(max(32 * 1024 * 1024, 1.25 * need), budget + budget // 4))

    cost = pl.CostEstimate(
        flops=2 * M * H_in * H_out,
        transcendentals=0,
        bytes_accessed=int(M * H_in * x_bytes
                           + H_in * H_out * w_bytes
                           + H_out * 4
                           + M * H_out * o_bytes),
    )

    def _build(single_buffer_resident):
        resident_kwargs = (
            dict(pipeline_mode=pl.Buffered(1)) if single_buffer_resident else {})
        return pl.pallas_call(
            _dense_bias_kernel,
            out_shape=jax.ShapeDtypeStruct((M, H_out), out_dtype),
            grid_spec=pltpu.PrefetchScalarGridSpec(
                num_scalar_prefetch=0,
                grid=grid,
                in_specs=[
                    pl.BlockSpec((tm_eff, H_in), lambda i: (i, 0)),          # activation row tile
                    pl.BlockSpec((H_in, H_out), lambda i: (0, 0),
                                 **resident_kwargs),                          # full weight, resident
                    pl.BlockSpec((1, H_out), lambda i: (0, 0),
                                 **resident_kwargs),                          # full bias, resident
                ],
                out_specs=pl.BlockSpec((tm_eff, H_out), lambda i: (i, 0)),
            ),
            compiler_params=pltpu.CompilerParams(
                dimension_semantics=("parallel",),
                vmem_limit_bytes=vmem_limit,
            ),
            cost_estimate=cost,
        )

    try:
        out2d = _build(True)(x2d, weight_t, b2d)
    except Exception:
        # Fallback: this JAX build rejected single-buffered resident operands; the constant
        # index_map still prevents re-DMA, only the VMEM footprint is slightly larger.
        out2d = _build(False)(x2d, weight_t, b2d)

    return out2d.reshape(B, S, H_out)


if __name__ == "__main__":
    key = jax.random.PRNGKey(0)
    k_x, k_res, k_w, k_b = jax.random.split(key, 4)

    # Small shapes consistent with the module: batch=2, seq=8, hidden=32.
    # (Note: H=32 < 128 exercises the masked-store path; real ViT H=768 is lane-dense.)
    B, S, H = 2, 8, 32
    hidden_states = jax.random.normal(k_x, (B, S, H), dtype=jnp.float32)
    input_tensor = jax.random.normal(k_res, (B, S, H), dtype=jnp.float32)  # unused by forward
    weight = jax.random.normal(k_w, (H, H), dtype=jnp.float32) * 0.02      # nn.Linear(H, H).weight
    bias = jax.random.normal(k_b, (H,), dtype=jnp.float32) * 0.02          # nn.Linear(H, H).bias

    # One-time (model-init) weight prep: [H_out, H_in] -> [H_in, H_out].
    w_t_f32, b_f32 = prepare_self_output_params(weight, bias)

    # f32 path, strict tolerance.
    out = jax.block_until_ready(
        quant_vit_self_output(hidden_states, input_tensor, w_t_f32, b_f32))
    ref = hidden_states @ weight.T + bias
    assert out.shape == (B, S, H)
    assert jnp.allclose(out, ref, atol=1e-5, rtol=1e-5), "f32 mismatch vs reference"

    # Non-divisible token count (ViT-style 197-token analogue) with a small forced tile:
    # exercises the masked partial-boundary-block path (no jnp.pad / slice anywhere).
    S_odd = 13
    hs_odd = jax.random.normal(k_x, (B, S_odd, H), dtype=jnp.float32)
    out_odd = jax.block_until_ready(
        quant_vit_self_output(hs_odd, None, w_t_f32, b_f32, tm=8))
    ref_odd = hs_odd @ weight.T + bias
    assert out_odd.shape == (B, S_odd, H)
    assert jnp.allclose(out_odd, ref_odd, atol=1e-5, rtol=1e-5), "partial-block mismatch"

    # bf16 MXU-input path (f32 accumulation + f32 bias add inside the kernel).
    w_t_bf16, b_bf16 = prepare_self_output_params(weight, bias, dtype=jnp.bfloat16)
    out_bf16 = jax.block_until_ready(
        quant_vit_self_output(hidden_states.astype(jnp.bfloat16), None, w_t_bf16, b_bf16))
    assert out_bf16.dtype == jnp.bfloat16
    assert jnp.allclose(out_bf16.astype(jnp.float32), ref, atol=2e-2, rtol=5e-2), \
        "bf16 mismatch vs reference"

    print("KERNEL_OK")
</pallas_src>

<mosaic_0001>
module attributes {stable_mosaic.version = 11 : i64} {
  func.func @_dense_bias_kernel(%arg0: i32, %arg1: memref<16x32xf32, #tpu.memory_space<vmem>>, %arg2: memref<32x32xf32, #tpu.memory_space<vmem>>, %arg3: memref<1x32xf32, #tpu.memory_space<vmem>>, %arg4: memref<16x32xf32, #tpu.memory_space<vmem>>) attributes {dimension_semantics = [#tpu.dimension_semantics<parallel>], iteration_bounds = array<i64: 1>, scalar_prefetch = 0 : i64, scratch_operands = 0 : i64, tpu.core_type = #tpu.core_type<tc>, window_params = [{transform_indices = @transform_0, window_bounds = array<i64: 16, 32>}, {pipeline_mode = #tpu.pipeline_mode<synchronous>, transform_indices = @transform_1, window_bounds = array<i64: 32, 32>}, {pipeline_mode = #tpu.pipeline_mode<synchronous>, transform_indices = @transform_2, window_bounds = array<i64: 1, 32>}, {transform_indices = @transform_3, window_bounds = array<i64: 16, 32>}]} {
    %c0 = arith.constant 0 : index
    %c0_0 = arith.constant 0 : index
    %0 = vector.load %arg1[%c0, %c0_0] : memref<16x32xf32, #tpu.memory_space<vmem>>, vector<16x32xf32>
    %c0_1 = arith.constant 0 : index
    %c0_2 = arith.constant 0 : index
    %1 = vector.load %arg2[%c0_1, %c0_2] : memref<32x32xf32, #tpu.memory_space<vmem>>, vector<32x32xf32>
    %cst = arith.constant dense<0.000000e+00> : vector<16x32xf32>
    %2 = tpu.matmul %0, %1, %cst {dimension_numbers = #tpu.dot_dimension_numbers<[1], [0], [0], [1], [0, 0, 1, 1], [], []>} : vector<16x32xf32>, vector<32x32xf32>, vector<16x32xf32> -> vector<16x32xf32>
    %c0_3 = arith.constant 0 : index
    %c0_4 = arith.constant 0 : index
    %3 = vector.load %arg3[%c0_3, %c0_4] : memref<1x32xf32, #tpu.memory_space<vmem>>, vector<1x32xf32>
    %4 = vector.broadcast %3 : vector<1x32xf32> to vector<16x32xf32>
    %5 = arith.addf %2, %4 : vector<16x32xf32>
    %c0_5 = arith.constant 0 : index
    %c0_6 = arith.constant 0 : index
    %6 = vector.load %arg4[%c0_5, %c0_6] : memref<16x32xf32, #tpu.memory_space<vmem>>, vector<16x32xf32>
    tpu.vector_store %arg4[%c0_5, %c0_6], %5 {strides = array<i32>} : memref<16x32xf32, #tpu.memory_space<vmem>>, vector<16x32xf32>,
    return
  }
  func.func @transform_0(%arg0: i32) -> (i32, i32) {
    %c0_i32 = arith.constant 0 : i32
    %c0_i32_0 = arith.constant 0 : i32
    return %arg0, %c0_i32 : i32, i32
  }
  func.func @transform_1(%arg0: i32) -> (i32, i32) {
    %c0_i32 = arith.constant 0 : i32
    %c0_i32_0 = arith.constant 0 : i32
    %c0_i32_1 = arith.constant 0 : i32
    return %c0_i32, %c0_i32_0 : i32, i32
  }
  func.func @transform_2(%arg0: i32) -> (i32, i32) {
    %c0_i32 = arith.constant 0 : i32
    %c0_i32_0 = arith.constant 0 : i32
    %c0_i32_1 = arith.constant 0 : i32
    return %c0_i32, %c0_i32_0 : i32, i32
  }
  func.func @transform_3(%arg0: i32) -> (i32, i32) {
    %c0_i32 = arith.constant 0 : i32
    %c0_i32_0 = arith.constant 0 : i32
    return %arg0, %c0_i32 : i32, i32
  }
}

module attributes {stable_mosaic.version = 11 : i64} {
  func.func @_dense_bias_kernel(%arg0: i32, %arg1: memref<16x32xf32, #tpu.memory_space<vmem>>, %arg2: memref<32x32xf32, #tpu.memory_space<vmem>>, %arg3: memref<1x32xf32, #tpu.memory_space<vmem>>, %arg4: memref<16x32xf32, #tpu.memory_space<vmem>>) attributes {dimension_semantics = [#tpu.dimension_semantics<parallel>], iteration_bounds = array<i64: 1>, scalar_prefetch = 0 : i64, scratch_operands = 0 : i64, tpu.core_type = #tpu.core_type<tc>, window_params = [{transform_indices = @transform_0, window_bounds = array<i64: 16, 32>}, {pipeline_mode = #tpu.pipeline_mode<synchronous>, transform_indices = @transform_1, window_bounds = array<i64: 32, 32>}, {pipeline_mode = #tpu.pipeline_mode<synchronous>, transform_indices = @transform_2, window_bounds = array<i64: 1, 32>}, {transform_indices = @transform_3, window_bounds = array<i64: 16, 32>}]} {
    %c0 = arith.constant 0 : index
    %c0_0 = arith.constant 0 : index
    %0 = vector.load %arg1[%c0, %c0_0] : memref<16x32xf32, #tpu.memory_space<vmem>>, vector<16x32xf32>
    %c0_1 = arith.constant 0 : index
    %c0_2 = arith.constant 0 : index
    %1 = vector.load %arg2[%c0_1, %c0_2] : memref<32x32xf32, #tpu.memory_space<vmem>>, vector<32x32xf32>
    %cst = arith.constant dense<0.000000e+00> : vector<16x32xf32>
    %2 = tpu.matmul %0, %1, %cst {dimension_numbers = #tpu.dot_dimension_numbers<[1], [0], [0], [1], [0, 0, 1, 1], [], []>} : vector<16x32xf32>, vector<32x32xf32>, vector<16x32xf32> -> vector<16x32xf32>
    %c0_3 = arith.constant 0 : index
    %c0_4 = arith.constant 0 : index
    %3 = vector.load %arg3[%c0_3, %c0_4] : memref<1x32xf32, #tpu.memory_space<vmem>>, vector<1x32xf32>
    %4 = vector.broadcast %3 : vector<1x32xf32> to vector<16x32xf32>
    %5 = arith.addf %2, %4 : vector<16x32xf32>
    %c0_5 = arith.constant 0 : index
    %c0_6 = arith.constant 0 : index
    %6 = vector.load %arg4[%c0_5, %c0_6] : memref<16x32xf32, #tpu.memory_space<vmem>>, vector<16x32xf32>
    tpu.vector_store %arg4[%c0_5, %c0_6], %5 {strides = array<i32>} : memref<16x32xf32, #tpu.memory_space<vmem>>, vector<16x32xf32>,
    return
  }
  func.func @transform_0(%arg0: i32) -> (i32, i32) {
    %c0_i32 = arith.constant 0 : i32
    %c0_i32_0 = arith.constant 0 : i32
    return %arg0, %c0_i32 : i32, i32
  }
  func.func @transform_1(%arg0: i32) -> (i32, i32) {
    %c0_i32 = arith.constant 0 : i32
    %c0_i32_0 = arith.constant 0 : i32
    %c0_i32_1 = arith.constant 0 : i32
    return %c0_i32, %c0_i32_0 : i32, i32
  }
  func.func @transform_2(%arg0: i32) -> (i32, i32) {
    %c0_i32 = arith.constant 0 : i32
    %c0_i32_0 = arith.constant 0 : i32
    %c0_i32_1 = arith.constant 0 : i32
    return %c0_i32, %c0_i32_0 : i32, i32
  }
  func.func @transform_3(%arg0: i32) -> (i32, i32) {
    %c0_i32 = arith.constant 0 : i32
    %c0_i32_0 = arith.constant 0 : i32
    return %arg0, %c0_i32 : i32, i32
  }
}

</mosaic_0001>

<bundles_post_ra>
// kernel: tpu_custom_call.1
= control target key start
LH: loop header
LB: loop body
LE: loop exit
PB: predicated region body
PF: predicated region fallthrough
CT: control target
= control target key end

     0   :  { %8 = vsyncpa [#allocation3], 0  ;;  %s299_s0 = inlined_call_operand.hbm [shape: f32[16,32], index: 0, kind: input, shape index: {}]   ;;  %s300_s1 = inlined_call_operand.hbm [shape: f32[32,32], index: 1, kind: input, shape index: {}]   ;;  %s301_s2 = inlined_call_operand.vmem [shape: f32[1,32], index: 2, kind: input, shape index: {}]   ;;  %s302_s3 = inlined_call_operand.hbm [shape: f32[16,32], index: 3, kind: output, shape index: {}]  }
   0x1   :  { %9 = vsyncpa [#allocation6], 0 }
   0x2   :  { %10 = vsyncpa [#allocation4], 0  ;;  %s249_s12 = smov [#allocation2]  }
   0x3   :  { %s16_s13 = sshll.u32 %s249_s12, 4  ;;  %s17_s13 = int_to_ptr.vmem [resolvable:$true] %s16_s13 }
   0x4   :  { %s191_s14 = scalar_lea.vmem %s17_s13, 256  ;;  %p196_p1 = scmp.lt.s32.totalorder %s17_s13, %s17_s13 }
   0x5   :  { %p192_p0 = scmp.ne.s32.totalorder %s17_s13, %s191_s14  ;;  %p197_p2 = scmp.lt.s32.totalorder %s191_s14, %s191_s14 }
   0x7   :  { %p198_p3 = por %p197_p2, %p196_p1 }
   0x9   :  { %p199_p4 = pnand %p198_p3, %p192_p0 }
   0xb   :  { %202 = shalt.err (!%p199_p4)
}
   0xc   :  { %s250_s15 = smov 128   ;;  %s251_s16 = smov 8  }
   0xd   :  { %22 = dma.hbm_to_vmem [thread:$0]  %s299_s0, 256, %s17_s13, [#allocation3], %s250_s15, %s250_s15, %s251_s16  }
   0xe   :  { %s252_s19 = smov [#allocation5]  }
   0xf   :  { %s28_s20 = sshll.u32 %s252_s19, 4  ;;  %s29_s20 = int_to_ptr.vmem [resolvable:$true] %s28_s20 }
  0x10   :  { %s211_s21 = scalar_lea.vmem %s29_s20, 512  ;;  %p216_p6 = scmp.lt.s32.totalorder %s29_s20, %s29_s20 }
  0x11   :  { %p212_p5 = scmp.ne.s32.totalorder %s29_s20, %s211_s21  ;;  %p217_p7 = scmp.lt.s32.totalorder %s211_s21, %s211_s21 }
  0x13   :  { %p218_p8 = por %p217_p7, %p216_p6 }
  0x15   :  { %p219_p9 = pnand %p218_p8, %p212_p5 }
  0x17   :  { %222 = shalt.err (!%p219_p9)
}
  0x18   :  { %34 = dma.hbm_to_vmem [thread:$0]  %s300_s1, 512, %s29_s20, [#allocation6], %s250_s15, %s250_s15, %s251_s16  }
  0x19   :  { %243 = dma.done.wait [#allocation3], 256  }
  0x1a   :  { %244 = vsyncadd [#allocation3], 4294967040 }
  0x1b   :  { %245 = dma.done.wait [#allocation6], 512  }
  0x1c   :  { %246 = vsyncadd [#allocation6], 4294966784  ;;  %vm56_vm0 = vcmask 261120   ;;  %v48_v0 = vld [vmem:[#allocation5 + $0x18] sm:$0xff]  ;;  %v47_v1 = vld [vmem:[#allocation5 + $0x10] sm:$0xff]  ;;  %s253_s24 = smov [#allocation7]  }
  0x1d   :  { %167 = vmatprep.subr.mxu0 %v48_v0  ;;  %v43_v2 = vld [vmem:[#allocation2] sm:$0xff]  ;;  %v46_v3 = vld [vmem:[#allocation5 + $0x8] sm:$0xff]  ;;  %v45_v4 = vld [vmem:[#allocation5] sm:$0xff]  ;;  %s145_s25 = sshll.u32 %s253_s24, 4  ;;  %s146_s25 = int_to_ptr.vmem [resolvable:$true] %s145_s25 }
  0x1e   :  { %168 = vmatpush3.msra.mxu0 %v48_v0  ;;  %175 = vmatprep.mubr.msk.f32.mxu0 %vm56_vm0, %v43_v2  ;;  %v44_v5 = vld [vmem:[#allocation2 + $0x8] sm:$0xff]  ;;  %v158_v6 = vld [vmem:[%s301_s2] ss:$0 sm:$0xff]  ;;  %s223_s26 = scalar_lea.vmem %s146_s25, 256  ;;  %p228_p11 = scmp.lt.s32.totalorder %s146_s25, %s146_s25 }
  0x1f   :  { %169 = vmatprep.subr.mxu0 %v47_v1  ;;  %p224_p10 = scmp.ne.s32.totalorder %s146_s25, %s223_s26  ;;  %p229_p12 = scmp.lt.s32.totalorder %s223_s26, %s223_s26 }
  0x20   :  { %170 = vmatpush3.msra.mxu0 %v47_v1 }
  0x21   :  { %171 = vmatprep.subr.mxu0 %v46_v3  ;;  %p230_p13 = por %p229_p12, %p228_p11 }
  0x22   :  { %172 = vmatpush3.msra.mxu0 %v46_v3 }
  0x23   :  { %173 = vmatprep.subr.mxu0 %v45_v4  ;;  %p231_p0 = pnand %p230_p13, %p224_p10 }
  0x24   :  { %174 = vmatpush3.msra.mxu0 %v45_v4 }
  0x25   :  { %176 = vmatmul.mubr.msk.f32.vlgmr.msra.gmra.mxu0 %vm56_vm0, %v44_v5 }
  0xe5   :  { %v177_v7 = vpop.f32.mrf.mxu0 }
  0xe6   :  { %v135_v8 = vadd.f32 %v177_v7, %v158_v6 }
  0xe7   :  { %v129_v9 = vpop.f32.mrf.mxu0 }
  0xe8   :  { %139 = vst.msk [vmem:[#allocation7 + $0x8] sm:$0xff] %vm56_vm0, %v135_v8  ;;  %v130_v10 = vadd.f32 %v158_v6, %v129_v9 }
  0xea   :  { %138 = vst.msk [vmem:[#allocation7] sm:$0xff] %vm56_vm0, %v130_v10 }
  0xeb   :  { %234 = shalt.err (!%p231_p0)
}
  0xec   :  { %151 = dma.vmem_to_hbm [thread:$0]  %s146_s25, 256, %s302_s3, [#allocation4], %s250_s15, %s250_s15, %s251_s16  }
  0xed   :  { %247 = dma.done.wait [#allocation4], 256  }
  0xee   :  { %248 = vsyncadd [#allocation4], 4294967040 }
  0xef   :  { %155 = vsyncpa [#allocation3], 1 }
  0xf0   :  { %156 = vsyncpa [#allocation6], 1 }
  0xf1   :  { %157 = vsyncpa [#allocation4], 1 }

// kernel: tpu_custom_call.1
= control target key start
LH: loop header
LB: loop body
LE: loop exit
PB: predicated region body
PF: predicated region fallthrough
CT: control target
= control target key end

     0   :  { %8 = vsyncpa [#allocation3], 0  ;;  %s299_s0 = inlined_call_operand.hbm [shape: f32[16,32], index: 0, kind: input, shape index: {}]   ;;  %s300_s1 = inlined_call_operand.hbm [shape: f32[32,32], index: 1, kind: input, shape index: {}]   ;;  %s301_s2 = inlined_call_operand.vmem [shape: f32[1,32], index: 2, kind: input, shape index: {}]   ;;  %s302_s3 = inlined_call_operand.hbm [shape: f32[16,32], index: 3, kind: output, shape index: {}]  }
   0x1   :  { %9 = vsyncpa [#allocation6], 0 }
   0x2   :  { %10 = vsyncpa [#allocation4], 0  ;;  %s249_s12 = smov [#allocation2]  }
   0x3   :  { %s16_s13 = sshll.u32 %s249_s12, 4  ;;  %s17_s13 = int_to_ptr.vmem [resolvable:$true] %s16_s13 }
   0x4   :  { %s191_s14 = scalar_lea.vmem %s17_s13, 256  ;;  %p196_p1 = scmp.lt.s32.totalorder %s17_s13, %s17_s13 }
   0x5   :  { %p192_p0 = scmp.ne.s32.totalorder %s17_s13, %s191_s14  ;;  %p197_p2 = scmp.lt.s32.totalorder %s191_s14, %s191_s14 }
   0x7   :  { %p198_p3 = por %p197_p2, %p196_p1 }
   0x9   :  { %p199_p4 = pnand %p198_p3, %p192_p0 }
   0xb   :  { %202 = shalt.err (!%p199_p4)
}
   0xc   :  { %s250_s15 = smov 128   ;;  %s251_s16 = smov 8  }
   0xd   :  { %22 = dma.hbm_to_vmem [thread:$0]  %s299_s0, 256, %s17_s13, [#allocation3], %s250_s15, %s250_s15, %s251_s16  }
   0xe   :  { %s252_s19 = smov [#allocation5]  }
   0xf   :  { %s28_s20 = sshll.u32 %s252_s19, 4  ;;  %s29_s20 = int_to_ptr.vmem [resolvable:$true] %s28_s20 }
  0x10   :  { %s211_s21 = scalar_lea.vmem %s29_s20, 512  ;;  %p216_p6 = scmp.lt.s32.totalorder %s29_s20, %s29_s20 }
  0x11   :  { %p212_p5 = scmp.ne.s32.totalorder %s29_s20, %s211_s21  ;;  %p217_p7 = scmp.lt.s32.totalorder %s211_s21, %s211_s21 }
  0x13   :  { %p218_p8 = por %p217_p7, %p216_p6 }
  0x15   :  { %p219_p9 = pnand %p218_p8, %p212_p5 }
  0x17   :  { %222 = shalt.err (!%p219_p9)
}
  0x18   :  { %34 = dma.hbm_to_vmem [thread:$0]  %s300_s1, 512, %s29_s20, [#allocation6], %s250_s15, %s250_s15, %s251_s16  }
  0x19   :  { %243 = dma.done.wait [#allocation3], 256  }
  0x1a   :  { %244 = vsyncadd [#allocation3], 4294967040 }
  0x1b   :  { %245 = dma.done.wait [#allocation6], 512  }
  0x1c   :  { %246 = vsyncadd [#allocation6], 4294966784  ;;  %vm56_vm0 = vcmask 261120   ;;  %v48_v0 = vld [vmem:[#allocation5 + $0x18] sm:$0xff]  ;;  %v47_v1 = vld [vmem:[#allocation5 + $0x10] sm:$0xff]  ;;  %s253_s24 = smov [#allocation7]  }
  0x1d   :  { %167 = vmatprep.subr.mxu0 %v48_v0  ;;  %v43_v2 = vld [vmem:[#allocation2] sm:$0xff]  ;;  %v46_v3 = vld [vmem:[#allocation5 + $0x8] sm:$0xff]  ;;  %v45_v4 = vld [vmem:[#allocation5] sm:$0xff]  ;;  %s145_s25 = sshll.u32 %s253_s24, 4  ;;  %s146_s25 = int_to_ptr.vmem [resolvable:$true] %s145_s25 }
  0x1e   :  { %168 = vmatpush3.msra.mxu0 %v48_v0  ;;  %175 = vmatprep.mubr.msk.f32.mxu0 %vm56_vm0, %v43_v2  ;;  %v44_v5 = vld [vmem:[#allocation2 + $0x8] sm:$0xff]  ;;  %v158_v6 = vld [vmem:[%s301_s2] ss:$0 sm:$0xff]  ;;  %s223_s26 = scalar_lea.vmem %s146_s25, 256  ;;  %p228_p11 = scmp.lt.s32.totalorder %s146_s25, %s146_s25 }
  0x1f   :  { %169 = vmatprep.subr.mxu0 %v47_v1  ;;  %p224_p10 = scmp.ne.s32.totalorder %s146_s25, %s223_s26  ;;  %p229_p12 = scmp.lt.s32.totalorder %s223_s26, %s223_s26 }
  0x20   :  { %170 = vmatpush3.msra.mxu0 %v47_v1 }
  0x21   :  { %171 = vmatprep.subr.mxu0 %v46_v3  ;;  %p230_p13 = por %p229_p12, %p228_p11 }
  0x22   :  { %172 = vmatpush3.msra.mxu0 %v46_v3 }
  0x23   :  { %173 = vmatprep.subr.mxu0 %v45_v4  ;;  %p231_p0 = pnand %p230_p13, %p224_p10 }
  0x24   :  { %174 = vmatpush3.msra.mxu0 %v45_v4 }
  0x25   :  { %176 = vmatmul.mubr.msk.f32.vlgmr.msra.gmra.mxu0 %vm56_vm0, %v44_v5 }
  0xe5   :  { %v177_v7 = vpop.f32.mrf.mxu0 }
  0xe6   :  { %v135_v8 = vadd.f32 %v177_v7, %v158_v6 }
  0xe7   :  { %v129_v9 = vpop.f32.mrf.mxu0 }
  0xe8   :  { %139 = vst.msk [vmem:[#allocation7 + $0x8] sm:$0xff] %vm56_vm0, %v135_v8  ;;  %v130_v10 = vadd.f32 %v158_v6, %v129_v9 }
  0xea   :  { %138 = vst.msk [vmem:[#allocation7] sm:$0xff] %vm56_vm0, %v130_v10 }
  0xeb   :  { %234 = shalt.err (!%p231_p0)
}
  0xec   :  { %151 = dma.vmem_to_hbm [thread:$0]  %s146_s25, 256, %s302_s3, [#allocation4], %s250_s15, %s250_s15, %s251_s16  }
  0xed   :  { %247 = dma.done.wait [#allocation4], 256  }
  0xee   :  { %248 = vsyncadd [#allocation4], 4294967040 }
  0xef   :  { %155 = vsyncpa [#allocation3], 1 }
  0xf0   :  { %156 = vsyncpa [#allocation6], 1 }
  0xf1   :  { %157 = vsyncpa [#allocation4], 1 }

</bundles_post_ra>
